<compile_context>
chip_gen: v7x
topology: tpu7x:2x2x1
jax: 0.10.0
libtpu: 0.0.40
codegen_flags: <defaults>
</compile_context>

<pallas_src>
import functools

import jax
import jax.numpy as jnp
from jax.experimental import pallas as pl
from jax.experimental.pallas import tpu as pltpu


def _round_up(x, m):
    return ((x + m - 1) // m) * m


def _vmem_capacity_bytes():
    """Physical VMEM of the local TPU generation (fallback: 64 MiB = v7x)."""
    try:
        return int(pltpu.get_tpu_info().vmem_capacity_bytes)
    except Exception:  # interpret mode / exotic backends
        return 64 << 20


def _image_embedding_head_kernel(
    x_ref, w1_ref, b1_ref, w2_ref, b2_ref, w3_ref, b3_ref, o_ref, acc_ref, *, normalize
):
    k = pl.program_id(1)

    @pl.when(k == 0)
    def _init():
        acc_ref[...] = jnp.zeros_like(acc_ref)

    # fc6 partial product for this K tile: bf16 x bf16 -> f32 accumulation (MXU).
    acc_ref[...] += jnp.dot(
        x_ref[...], w1_ref[...], preferred_element_type=jnp.float32
    )

    @pl.when(k == pl.num_programs(1) - 1)
    def _epilogue():
        # fc6 bias + ReLU (bias added exactly once, after the full K reduction).
        h = jnp.maximum(acc_ref[...] + b1_ref[...], 0.0)

        # fc7 + ReLU (W2 resident in VMEM, single-buffered, constant index_map).
        h = (
            jnp.dot(h.astype(w2_ref.dtype), w2_ref[...],
                    preferred_element_type=jnp.float32)
            + b2_ref[...]
        )
        h = jnp.maximum(h, 0.0)

        if normalize:
            # Normalize(p=2): rsqrt goes to the EUP slot.
            # NOTE: PyTorch F.normalize divides by max(||h||, eps); the
            # rsqrt(sum + 1e-12) form differs only for near-zero rows.
            h = h * jax.lax.rsqrt(
                jnp.sum(h * h, axis=-1, keepdims=True) + 1e-12
            )

        # fflayer: Linear(hidden -> output_size) + Tanh.
        out = (
            jnp.dot(h.astype(w3_ref.dtype), w3_ref[...],
                    preferred_element_type=jnp.float32)
            + b3_ref[...]
        )
        o_ref[...] = jnp.tanh(out).astype(o_ref.dtype)


def prepare_params(params, *, block_k=1024, compute_dtype=jnp.bfloat16):
    """One-time parameter prep: cast weights to bf16, pad W1's K axis.

    Hoisting the f32->bf16 cast / pad here keeps the large W1 read+rewrite out
    of every forward call (it would roughly double HBM traffic for a
    memory-bound kernel).  block_k defaults to 1024 (good on v7x); use 512 on
    v5e where the per-step DMA is already long enough to hide step overhead.
    """
    assert block_k % 128 == 0, "block_k must be lane-aligned (multiple of 128)"
    f_conv, hidden = params["w1"].shape
    out_size = params["w3"].shape[1]
    tk = min(block_k, _round_up(f_conv, 128))
    pf = _round_up(f_conv, tk)
    w1 = params["w1"].astype(compute_dtype)
    if pf != f_conv:
        w1 = jnp.pad(w1, ((0, pf - f_conv), (0, 0)))
    return {
        "w1": w1,                                            # (pf, hidden) bf16
        "w2": params["w2"].astype(compute_dtype),            # (hidden, hidden) bf16
        "w3": params["w3"].astype(compute_dtype),            # (hidden, out) bf16
        "b1": params["b1"].astype(jnp.float32).reshape(1, hidden),
        "b2": params["b2"].astype(jnp.float32).reshape(1, hidden),
        "b3": params["b3"].astype(jnp.float32).reshape(1, out_size),
        "f_conv": f_conv,
        "block_k": tk,
        "compute_dtype": compute_dtype,
    }


def image_embedding_forward(
    image_feats,
    image_ids,
    prepared,
    *,
    image_channel_type="normi",
    num_batch_tiles=1,
    out_dtype=jnp.float32,
):
    """Pallas forward. `image_ids` is accepted (as in the PyTorch forward) but unused.

    num_batch_tiles: 1 (default) streams W1 from HBM exactly once per call —
    optimal on single-core chips (v5e/v6e) since the kernel is HBM-bound on W1.
    On v7x set num_batch_tiles=2 (== TensorCores) so the "parallel" batch axis
    keeps both cores busy.
    """
    del image_ids  # unused by the PyTorch forward pass as well

    compute_dtype = prepared["compute_dtype"]
    batch, f_conv_in = image_feats.shape
    f_conv = prepared["f_conv"]
    assert f_conv_in == f_conv, "feature dim mismatch with prepared params"
    pf, hidden = prepared["w1"].shape
    out_size = prepared["w3"].shape[1]
    tk = prepared["block_k"]

    x = image_feats.astype(compute_dtype)

    # bf16 packs 2 rows per sublane -> keep batch tiles a multiple of 16 rows.
    num_batch_tiles = max(1, int(num_batch_tiles))
    pb = _round_up(batch, 16 * num_batch_tiles)
    tb = pb // num_batch_tiles
    if (pb, pf) != (batch, f_conv):
        x = jnp.pad(x, ((0, pb - batch), (0, pf - f_conv)))

    grid = (num_batch_tiles, pf // tk)

    # --- VMEM plan: double-buffered streams, single-buffered residents --------
    wb = jnp.dtype(compute_dtype).itemsize
    ob = jnp.dtype(out_dtype).itemsize
    est = 2 * tb * tk * wb                       # x tile (double-buffered)
    est += 2 * tk * hidden * wb                  # W1 K-tile (double-buffered)
    est += hidden * hidden * wb                  # W2 (Buffered(1))
    est += hidden * out_size * wb                # W3 (Buffered(1))
    est += 4 * 8 * (2 * hidden + out_size)       # f32 biases, sublane-padded, Buffered(1)
    est += tb * hidden * 4                       # f32 accumulator scratch
    est += 2 * tb * out_size * ob                # output tile (double-buffered)
    est += tb * hidden * (4 + wb) + tb * out_size * 4  # epilogue h (f32+bf16) + pre-tanh
    cap = _vmem_capacity_bytes()
    vmem_limit = int(min(cap - (8 << 20),
                         max(int(est * 1.25) + (4 << 20), 32 << 20)))

    kernel = functools.partial(
        _image_embedding_head_kernel,
        normalize=(image_channel_type.lower() == "normi"),
    )

    resident = dict(pipeline_mode=pl.Buffered(1))  # constant index_map -> 1 VMEM copy

    out = pl.pallas_call(
        kernel,
        out_shape=jax.ShapeDtypeStruct((pb, out_size), out_dtype),
        grid_spec=pltpu.PrefetchScalarGridSpec(
            num_scalar_prefetch=0,
            grid=grid,
            in_specs=[
                pl.BlockSpec((tb, tk), lambda b, k: (b, k)),       # x tile (streamed)
                pl.BlockSpec((tk, hidden), lambda b, k: (k, 0)),   # W1 K-tile (streamed)
                pl.BlockSpec((1, hidden), lambda b, k: (0, 0), **resident),         # b1
                pl.BlockSpec((hidden, hidden), lambda b, k: (0, 0), **resident),    # W2
                pl.BlockSpec((1, hidden), lambda b, k: (0, 0), **resident),         # b2
                pl.BlockSpec((hidden, out_size), lambda b, k: (0, 0), **resident),  # W3
                pl.BlockSpec((1, out_size), lambda b, k: (0, 0), **resident),       # b3
            ],
            out_specs=pl.BlockSpec((tb, out_size), lambda b, k: (b, 0)),
            scratch_shapes=[pltpu.VMEM((tb, hidden), jnp.float32)],
        ),
        compiler_params=pltpu.CompilerParams(
            dimension_semantics=("parallel", "arbitrary"),
            vmem_limit_bytes=vmem_limit,
        ),
    )(x, prepared["w1"], prepared["b1"], prepared["w2"], prepared["b2"],
      prepared["w3"], prepared["b3"])

    return out[:batch]


def _reference_forward(image_feats, params, *, image_channel_type="normi",
                       compute_dtype=jnp.bfloat16):
    """Pure-JAX reference with the same bf16-stream / f32-accumulate numerics."""
    x = image_feats.astype(compute_dtype)
    w1 = params["w1"].astype(compute_dtype)
    w2 = params["w2"].astype(compute_dtype)
    w3 = params["w3"].astype(compute_dtype)
    h = jnp.dot(x, w1, preferred_element_type=jnp.float32) + params["b1"]
    h = jnp.maximum(h, 0.0)
    h = jnp.dot(h.astype(compute_dtype), w2,
                preferred_element_type=jnp.float32) + params["b2"]
    h = jnp.maximum(h, 0.0)
    if image_channel_type.lower() == "normi":
        h = h * jax.lax.rsqrt(jnp.sum(h * h, axis=-1, keepdims=True) + 1e-12)
    out = jnp.dot(h.astype(compute_dtype), w3,
                  preferred_element_type=jnp.float32) + params["b3"]
    return jnp.tanh(out)


def init_params(key, f_conv, hidden, output_size):
    """Deterministic synthetic weights. PyTorch Linear stores (out, in) and computes
    x @ W.T; we store the (in, out) transpose directly so the kernel does x @ W."""
    k1, k2, k3 = jax.random.split(key, 3)
    scale = 0.05
    return {
        "w1": scale * jax.random.normal(k1, (f_conv, hidden), jnp.float32),
        "b1": jnp.zeros((1, hidden), jnp.float32),
        "w2": scale * jax.random.normal(k2, (hidden, hidden), jnp.float32),
        "b2": jnp.full((1, hidden), 0.01, jnp.float32),
        "w3": scale * jax.random.normal(k3, (hidden, output_size), jnp.float32),
        "b3": jnp.full((1, output_size), -0.01, jnp.float32),
    }


if __name__ == "__main__":
    # Small shapes standing in for the real ones:
    #   F_conv = 256   (stands for 25088 = 512*7*7 flattened VGG conv features)
    #   hidden = 128   (stands for 4096)
    #   output = 128   (stands for output_size=1024)
    batch, f_conv, hidden, output_size = 2, 256, 128, 128

    key = jax.random.PRNGKey(0)
    k_in, k_par = jax.random.split(key)

    image_feats = jax.random.normal(k_in, (batch, f_conv), jnp.float32)
    image_ids = jnp.arange(batch, dtype=jnp.int32)  # unused by forward, mirrors signature
    params = init_params(k_par, f_conv, hidden, output_size)

    # One-time prep (bf16 cast + K padding hoisted out of the per-call path).
    # block_k=128 -> 2 K grid steps, exercising the accumulator init/epilogue path.
    prepared = prepare_params(params, block_k=128)

    out = image_embedding_forward(
        image_feats, image_ids, prepared,
        image_channel_type="normi", num_batch_tiles=1,
    )
    out = jax.block_until_ready(out)

    ref = jax.block_until_ready(
        _reference_forward(image_feats, params, image_channel_type="normi")
    )

    assert out.shape == (batch, output_size)
    assert bool(jnp.all(jnp.isfinite(out)))
    assert bool(jnp.all(jnp.abs(out) <= 1.0))  # tanh range
    assert bool(jnp.allclose(out, ref, atol=2e-2, rtol=2e-2))

    print("KERNEL_OK")
</pallas_src>

<mosaic_0001>
module attributes {stable_mosaic.version = 11 : i64} {
  func.func @_image_embedding_head_kernel(%arg0: i32, %arg1: i32, %arg2: memref<16x128xbf16, #tpu.memory_space<vmem>>, %arg3: memref<128x128xbf16, #tpu.memory_space<vmem>>, %arg4: memref<1x128xf32, #tpu.memory_space<vmem>>, %arg5: memref<128x128xbf16, #tpu.memory_space<vmem>>, %arg6: memref<1x128xf32, #tpu.memory_space<vmem>>, %arg7: memref<128x128xbf16, #tpu.memory_space<vmem>>, %arg8: memref<1x128xf32, #tpu.memory_space<vmem>>, %arg9: memref<16x128xf32, #tpu.memory_space<vmem>>, %arg10: memref<16x128xf32, #tpu.memory_space<vmem>>) attributes {dimension_semantics = [#tpu.dimension_semantics<parallel>, #tpu.dimension_semantics<arbitrary>], iteration_bounds = array<i64: 1, 2>, scalar_prefetch = 0 : i64, scratch_operands = 1 : i64, tpu.core_type = #tpu.core_type<tc>, window_params = [{transform_indices = @transform_0, window_bounds = array<i64: 16, 128>}, {transform_indices = @transform_1, window_bounds = array<i64: 128, 128>}, {pipeline_mode = #tpu.pipeline_mode<synchronous>, transform_indices = @transform_2, window_bounds = array<i64: 1, 128>}, {pipeline_mode = #tpu.pipeline_mode<synchronous>, transform_indices = @transform_3, window_bounds = array<i64: 128, 128>}, {pipeline_mode = #tpu.pipeline_mode<synchronous>, transform_indices = @transform_4, window_bounds = array<i64: 1, 128>}, {pipeline_mode = #tpu.pipeline_mode<synchronous>, transform_indices = @transform_5, window_bounds = array<i64: 128, 128>}, {pipeline_mode = #tpu.pipeline_mode<synchronous>, transform_indices = @transform_6, window_bounds = array<i64: 1, 128>}, {transform_indices = @transform_7, window_bounds = array<i64: 16, 128>}]} {
    %c0_i32 = arith.constant 0 : i32
    %0 = arith.cmpi eq, %arg1, %c0_i32 : i32
    %1 = arith.extui %0 : i1 to i32
    %c0_i32_0 = arith.constant 0 : i32
    %2 = arith.cmpi ne, %1, %c0_i32_0 : i32
    scf.if %2 {
      %cst_9 = arith.constant 0.000000e+00 : f32
      %12 = vector.broadcast %cst_9 : f32 to vector<16x128xf32>
      %c0_10 = arith.constant 0 : index
      %c0_11 = arith.constant 0 : index
      %13 = vector.load %arg10[%c0_10, %c0_11] : memref<16x128xf32, #tpu.memory_space<vmem>>, vector<16x128xf32>
      tpu.vector_store %arg10[%c0_10, %c0_11], %12 {strides = array<i32>} : memref<16x128xf32, #tpu.memory_space<vmem>>, vector<16x128xf32>,
    } else {
    }
    %c0 = arith.constant 0 : index
    %c0_1 = arith.constant 0 : index
    %3 = vector.load %arg10[%c0, %c0_1] : memref<16x128xf32, #tpu.memory_space<vmem>>, vector<16x128xf32>
    %c0_2 = arith.constant 0 : index
    %c0_3 = arith.constant 0 : index
    %4 = vector.load %arg2[%c0_2, %c0_3] : memref<16x128xbf16, #tpu.memory_space<vmem>>, vector<16x128xbf16>
    %c0_4 = arith.constant 0 : index
    %c0_5 = arith.constant 0 : index
    %5 = vector.load %arg3[%c0_4, %c0_5] : memref<128x128xbf16, #tpu.memory_space<vmem>>, vector<128x128xbf16>
    %cst = arith.constant dense<0.000000e+00> : vector<16x128xf32>
    %6 = tpu.matmul %4, %5, %cst {dimension_numbers = #tpu.dot_dimension_numbers<[1], [0], [0], [1], [0, 0, 1, 1], [], []>} : vector<16x128xbf16>, vector<128x128xbf16>, vector<16x128xf32> -> vector<16x128xf32>
    %7 = arith.addf %3, %6 : vector<16x128xf32>
    %c0_6 = arith.constant 0 : index
    %c0_7 = arith.constant 0 : index
    %8 = vector.load %arg10[%c0_6, %c0_7] : memref<16x128xf32, #tpu.memory_space<vmem>>, vector<16x128xf32>
    tpu.vector_store %arg10[%c0_6, %c0_7], %7 {strides = array<i32>} : memref<16x128xf32, #tpu.memory_space<vmem>>, vector<16x128xf32>,
    %c1_i32 = arith.constant 1 : i32
    %9 = arith.cmpi eq, %arg1, %c1_i32 : i32
    %10 = arith.extui %9 : i1 to i32
    %c0_i32_8 = arith.constant 0 : i32
    %11 = arith.cmpi ne, %10, %c0_i32_8 : i32
    scf.if %11 {
      %c0_9 = arith.constant 0 : index
      %c0_10 = arith.constant 0 : index
      %12 = vector.load %arg10[%c0_9, %c0_10] : memref<16x128xf32, #tpu.memory_space<vmem>>, vector<16x128xf32>
      %c0_11 = arith.constant 0 : index
      %c0_12 = arith.constant 0 : index
      %13 = vector.load %arg4[%c0_11, %c0_12] : memref<1x128xf32, #tpu.memory_space<vmem>>, vector<1x128xf32>
      %14 = vector.broadcast %13 : vector<1x128xf32> to vector<16x128xf32>
      %15 = arith.addf %12, %14 : vector<16x128xf32>
      %cst_13 = arith.constant 0.000000e+00 : f32
      %16 = vector.broadcast %cst_13 : f32 to vector<16x128xf32>
      %17 = arith.maximumf %15, %16 : vector<16x128xf32>
      %18 = arith.truncf %17 : vector<16x128xf32> to vector<16x128xbf16>
      %c0_14 = arith.constant 0 : index
      %c0_15 = arith.constant 0 : index
      %19 = vector.load %arg5[%c0_14, %c0_15] : memref<128x128xbf16, #tpu.memory_space<vmem>>, vector<128x128xbf16>
      %cst_16 = arith.constant dense<0.000000e+00> : vector<16x128xf32>
      %20 = tpu.matmul %18, %19, %cst_16 {dimension_numbers = #tpu.dot_dimension_numbers<[1], [0], [0], [1], [0, 0, 1, 1], [], []>} : vector<16x128xbf16>, vector<128x128xbf16>, vector<16x128xf32> -> vector<16x128xf32>
      %c0_17 = arith.constant 0 : index
      %c0_18 = arith.constant 0 : index
      %21 = vector.load %arg6[%c0_17, %c0_18] : memref<1x128xf32, #tpu.memory_space<vmem>>, vector<1x128xf32>
      %22 = vector.broadcast %21 : vector<1x128xf32> to vector<16x128xf32>
      %23 = arith.addf %20, %22 : vector<16x128xf32>
      %cst_19 = arith.constant 0.000000e+00 : f32
      %24 = vector.broadcast %cst_19 : f32 to vector<16x128xf32>
      %25 = arith.maximumf %23, %24 : vector<16x128xf32>
      %26 = arith.mulf %25, %25 : vector<16x128xf32>
      %cst_20 = arith.constant dense<0.000000e+00> : vector<16xf32>
      %27 = vector.multi_reduction <add>, %26, %cst_20 [1] : vector<16x128xf32> to vector<16xf32>
      %28 = vector.shape_cast %27 : vector<16xf32> to vector<16x1xf32>
      %cst_21 = arith.constant 9.99999996E-13 : f32
      %29 = vector.broadcast %cst_21 : f32 to vector<16x1xf32>
      %30 = arith.addf %28, %29 : vector<16x1xf32>
      %31 = math.rsqrt %30 : vector<16x1xf32>
      %32 = vector.broadcast %31 : vector<16x1xf32> to vector<16x128xf32>
      %33 = arith.mulf %25, %32 : vector<16x128xf32>
      %34 = arith.truncf %33 : vector<16x128xf32> to vector<16x128xbf16>
      %c0_22 = arith.constant 0 : index
      %c0_23 = arith.constant 0 : index
      %35 = vector.load %arg7[%c0_22, %c0_23] : memref<128x128xbf16, #tpu.memory_space<vmem>>, vector<128x128xbf16>
      %cst_24 = arith.constant dense<0.000000e+00> : vector<16x128xf32>
      %36 = tpu.matmul %34, %35, %cst_24 {dimension_numbers = #tpu.dot_dimension_numbers<[1], [0], [0], [1], [0, 0, 1, 1], [], []>} : vector<16x128xbf16>, vector<128x128xbf16>, vector<16x128xf32> -> vector<16x128xf32>
      %c0_25 = arith.constant 0 : index
      %c0_26 = arith.constant 0 : index
      %37 = vector.load %arg8[%c0_25, %c0_26] : memref<1x128xf32, #tpu.memory_space<vmem>>, vector<1x128xf32>
      %38 = vector.broadcast %37 : vector<1x128xf32> to vector<16x128xf32>
      %39 = arith.addf %36, %38 : vector<16x128xf32>
      %40 = math.tanh %39 : vector<16x128xf32>
      %c0_27 = arith.constant 0 : index
      %c0_28 = arith.constant 0 : index
      %41 = vector.load %arg9[%c0_27, %c0_28] : memref<16x128xf32, #tpu.memory_space<vmem>>, vector<16x128xf32>
      tpu.vector_store %arg9[%c0_27, %c0_28], %40 {strides = array<i32>} : memref<16x128xf32, #tpu.memory_space<vmem>>, vector<16x128xf32>,
    } else {
    }
    return
  }
  func.func @transform_0(%arg0: i32, %arg1: i32) -> (i32, i32) {
    %c0_i32 = arith.constant 0 : i32
    return %arg0, %arg1 : i32, i32
  }
  func.func @transform_1(%arg0: i32, %arg1: i32) -> (i32, i32) {
    %c0_i32 = arith.constant 0 : i32
    %c0_i32_0 = arith.constant 0 : i32
    return %arg1, %c0_i32 : i32, i32
  }
  func.func @transform_2(%arg0: i32, %arg1: i32) -> (i32, i32) {
    %c0_i32 = arith.constant 0 : i32
    %c0_i32_0 = arith.constant 0 : i32
    %c0_i32_1 = arith.constant 0 : i32
    return %c0_i32, %c0_i32_0 : i32, i32
  }
  func.func @transform_3(%arg0: i32, %arg1: i32) -> (i32, i32) {
    %c0_i32 = arith.constant 0 : i32
    %c0_i32_0 = arith.constant 0 : i32
    %c0_i32_1 = arith.constant 0 : i32
    return %c0_i32, %c0_i32_0 : i32, i32
  }
  func.func @transform_4(%arg0: i32, %arg1: i32) -> (i32, i32) {
    %c0_i32 = arith.constant 0 : i32
    %c0_i32_0 = arith.constant 0 : i32
    %c0_i32_1 = arith.constant 0 : i32
    return %c0_i32, %c0_i32_0 : i32, i32
  }
  func.func @transform_5(%arg0: i32, %arg1: i32) -> (i32, i32) {
    %c0_i32 = arith.constant 0 : i32
    %c0_i32_0 = arith.constant 0 : i32
    %c0_i32_1 = arith.constant 0 : i32
    return %c0_i32, %c0_i32_0 : i32, i32
  }
  func.func @transform_6(%arg0: i32, %arg1: i32) -> (i32, i32) {
    %c0_i32 = arith.constant 0 : i32
    %c0_i32_0 = arith.constant 0 : i32
    %c0_i32_1 = arith.constant 0 : i32
    return %c0_i32, %c0_i32_0 : i32, i32
  }
  func.func @transform_7(%arg0: i32, %arg1: i32) -> (i32, i32) {
    %c0_i32 = arith.constant 0 : i32
    %c0_i32_0 = arith.constant 0 : i32
    return %arg0, %c0_i32 : i32, i32
  }
}

</mosaic_0001>

<bundles_post_ra>
// kernel: tpu_custom_call.1
= control target key start
LH: loop header
LB: loop body
LE: loop exit
PB: predicated region body
PF: predicated region fallthrough
CT: control target
= control target key end

     0   :  { %s1739_s0 = inlined_call_operand.hbm [shape: bf16[16,256], index: 0, kind: input, shape index: {}]   ;;  %s1740_s1 = inlined_call_operand.hbm [shape: bf16[256,128], index: 1, kind: input, shape index: {}]   ;;  %s1741_s2 = inlined_call_operand.vmem [shape: f32[1,128], index: 2, kind: input, shape index: {}]   ;;  %s1742_s3 = inlined_call_operand.hbm [shape: bf16[128,128], index: 3, kind: input, shape index: {}]   ;;  %s1743_s4 = inlined_call_operand.vmem [shape: f32[1,128], index: 4, kind: input, shape index: {}]   ;;  %s1744_s5 = inlined_call_operand.hbm [shape: bf16[128,128], index: 5, kind: input, shape index: {}]   ;;  %s1745_s6 = inlined_call_operand.vmem [shape: f32[1,128], index: 6, kind: input, shape index: {}]   ;;  %s1746_s7 = inlined_call_operand.hbm [shape: f32[16,128], index: 7, kind: output, shape index: {}]  }
   0x1   :  { %1754 = sst [smem:[#allocation18_spill]] %s1739_s0 }
   0x2   :  { %1755 = sst [smem:[#allocation19_spill]] %s1742_s3 }
   0x3   :  { %1756 = sst [smem:[#allocation20_spill]] %s1744_s5 }
   0x4   :  { %1757 = sst [smem:[#allocation21_spill]] %s1746_s7 }
   0x5   :  { %12 = vsyncpa [#allocation4], 0 }
   0x6   :  { %14 = vsyncpa [#allocation4 + $0x1], 0 }
   0x7   :  { %15 = vsyncpa [#allocation7], 0 }
   0x8   :  { %17 = vsyncpa [#allocation7 + $0x1], 0 }
   0x9   :  { %18 = vsyncpa [#allocation10], 0 }
   0xa   :  { %19 = vsyncpa [#allocation5], 0  ;;  %s1415_s24 = smov 0   ;;  %s1417_s25 = smov 0  }
   0xb   :  { %s1419_s26 = smov 0   ;;  %s1421_s27 = smov 0  }
   0xc   :  { %s1423_s28 = smov 0   ;;  %s1425_s29 = smov 0  }
   0xd LB: > { %s1444_s30 = sadd.s32 4294967295, %s1358_s29   ;;  %p53_p0 = scmp.ne.s32.totalorder %s1346_s26, %s1342_s25  ;;  %s1358_s29 = sphi %s1425_s29, %s25_s29   ;;  %s1354_s28 = sphi %s1423_s28, %s1781_s28   ;;  %s1350_s27 = sphi %s1421_s27, %s1780_s27   ;;  %s1346_s26 = sphi %s1419_s26, %s1779_s26   ;;  %s1342_s25 = sphi %s1417_s25, %s1778_s25   ;;  %s1338_s24 = sphi %s1415_s24, %s1777_s24  }
   0xe   : > { %p54_p1 = scmp.eq.s32.totalorder %s1358_s29, 0  ;;  %p59_p2 = scmp.ne.s32.totalorder %s1342_s25, %s1338_s24 }
   0xf   : > { %p1747_p3 = scmp.eq.s32.totalorder %s1444_s30, 0  ;;  %p883_p5 = scmp.ge.s32.totalorder %s1358_s29, 1 }
  0x10   : > { %p55_p4 = por %p54_p1, %p53_p0  ;;  %p227_p7 = scmp.lt.s32.totalorder %s1358_s29, 3 }
  0x11   : > { %p1455_p6 = por %p1747_p3, %p59_p2  ;;  %s1360_s11 = smov [#allocation8]  }
  0x12   : > { %p1460_p8 = pnand %p883_p5, %p227_p7  ;;  %s242_s12 = sshll.u32 %s1360_s11, 4  ;;  %s1464_s12 = int_to_ptr.vmem [resolvable:$true] %s242_s12 }
  0x13   : > { %s1758_s9 = scalar_select %p1455_p6, 1, 0 }
  0x14   : > { %s1759_s10 = scalar_select %p1460_p8, 1, 0 }
  0x15   : > { %p1035_p9 = pneg %p1460_p8  ;;  %p1051_p10 = scmp.lt.s32.totalorder %s1358_s29, 2 }
  0x16   : > { %s1361_s15 = smov [#allocation9]   ;;  %s1762_s3 = sld [smem:[#allocation19_spill]] }
  0x17   : > { %p1471_p11 = pnand %p1035_p9, %p1747_p3  ;;  %p1475_p12 = pnand %p1051_p10, %p55_p4 }
  0x18   : > { %s258_s16 = sshll.u32 %s1361_s15, 4  ;;  %s1479_s16 = int_to_ptr.vmem [resolvable:$true] %s258_s16 }
  0x19   : > { %p1152_p0 = pneg %p1471_p11 }
  0x1c   : > { %s1150_s19 = scalar_lea.hbm %s1762_s3, 1024 }
  0x1d   : > { %p1151_p13 = scmp.ne.s32.totalorder %s1762_s3, %s1150_s19  ;;  %p1157_p4 = scmp.lt.u32.totalorder %s1150_s19, %s1762_s3 }
  0x1f   : > { %p1153_p1 = pnand %p1152_p0, %p1151_p13 }
  0x21   : > { %p1154_p2 = pneg %p1153_p1 }
  0x23   : > { %p1159_p5 = pnand %p1157_p4, %p1154_p2 }
  0x25   : > { %1162 = shalt.err (!%p1159_p5)
}
  0x26   : > { %s1163_s24 = scalar_lea.vmem %s1464_s12, 1024  ;;  %p1171_p3 = scmp.lt.s32.totalorder %s1464_s12, %s1464_s12 }
  0x27   : > { %p1164_p7 = scmp.ne.s32.totalorder %s1464_s12, %s1163_s24  ;;  %p1172_p13 = scmp.lt.s32.totalorder %s1163_s24, %s1163_s24 }
  0x29   : > { %p1166_p9 = pnand %p1164_p7, %p1152_p0  ;;  %p1173_p1 = por %p1172_p13, %p1171_p3 }
  0x2b   : > { %p1167_p10 = pneg %p1166_p9 }
  0x2d   : > { %p1174_p6 = pnand %p1173_p1, %p1167_p10 }
  0x2f   : > { %1177 = shalt.err (!%p1174_p6)
}
  0x30   : > { %s1749_s11 = smov 64   ;;  %s1363_s15 = smov 4  }
  0x31   : > { %1038 = dma.hbm_to_vmem [thread:$0]  (!%p1471_p11), %s1762_s3, 1024, %s1464_s12, [#allocation7], %s1749_s11, %s1749_s11, %s1363_s15  }
  0x32   : > { %s1763_s5 = sld [smem:[#allocation20_spill]] }
  0x38   : > { %s1178_s21 = scalar_lea.hbm %s1763_s5, 1024 }
  0x39   : > { %p1179_p3 = scmp.ne.s32.totalorder %s1763_s5, %s1178_s21  ;;  %p1185_p4 = scmp.lt.u32.totalorder %s1178_s21, %s1763_s5 }
  0x3b   : > { %p1181_p6 = pnand %p1179_p3, %p1152_p0 }
  0x3d   : > { %p1182_p2 = pneg %p1181_p6 }
  0x3f   : > { %p1187_p5 = pnand %p1185_p4, %p1182_p2 }
  0x41   : > { %1190 = shalt.err (!%p1187_p5)
}
  0x42   : > { %s1191_s12 = scalar_lea.vmem %s1479_s16, 1024  ;;  %p1199_p13 = scmp.lt.s32.totalorder %s1479_s16, %s1479_s16 }
  0x43   : > { %p1192_p7 = scmp.ne.s32.totalorder %s1479_s16, %s1191_s12  ;;  %p1200_p1 = scmp.lt.s32.totalorder %s1191_s12, %s1191_s12 }
  0x45   : > { %p1194_p9 = pnand %p1192_p7, %p1152_p0  ;;  %p1201_p3 = por %p1200_p1, %p1199_p13 }
  0x47   : > { %p1195_p10 = pneg %p1194_p9 }
  0x49   : > { %p1202_p6 = pnand %p1201_p3, %p1195_p10 }
  0x4b   : > { %1205 = shalt.err (!%p1202_p6)
}
  0x4c   : > { %1041 = dma.hbm_to_vmem [thread:$0]  (!%p1471_p11), %s1763_s5, 1024, %s1479_s16, [#allocation10], %s1749_s11, %s1749_s11, %s1363_s15  }
  0x4d   : > { %s1540_s18 = sand.u32 1, %s1346_s26   ;;  %s34_s19 = sadd.s32 1, %s1354_s28 }
  0x4e   : > { %p35_p0 = scmp.ge.s32.totalorder %s34_s19, 2  ;;  %s887_s13 = sshll.u32 %s1540_s18, 3 }
  0x4f   : > { %s888_s20 = sshll.u32 %s1354_s28, 6  ;;  %s1765_s0 = sld [smem:[#allocation18_spill]] }
  0x50   : > { %s1783_s19 = smov (%p35_p0, %s34_s19), 0  ;;  %s279_s16 = scalar_lea.vmem [#allocation3], %s887_s13 }
  0x51   : > { %1764 = sst [smem:[#allocation17_spill]] %s1783_s19  ;;  %s288_s24 = sshll.u32 %s279_s16, 4  ;;  %s1554_s24 = int_to_ptr.vmem [resolvable:$true] %s288_s24 }
  0x52   : > { %s42_s12 = ssub.s32 %s1354_s28, %s1783_s19  ;;  %s276_s17 = scalar_lea.sflag [#allocation4], %s1540_s18 }
  0x53   : > { %p1556_p11 = scmp.eq.s32.totalorder %s42_s12, 0  ;;  %p1208_p4 = pneg %p1475_p12 }
  0x55   : > { %s1550_s23 = scalar_lea.hbm %s1765_s0, %s888_s20  ;;  %s1211_s13 = scalar_lea.hbm %s1765_s0, 256 }
  0x56   : > { %s1206_s11 = scalar_lea.hbm %s1550_s23, 128  ;;  %p1212_p9 = scmp.lt.u32.totalorder %s1550_s23, %s1765_s0 }
  0x57   : > { %p1207_p2 = scmp.ne.s32.totalorder %s1550_s23, %s1206_s11  ;;  %p1213_p10 = scmp.lt.u32.totalorder %s1211_s13, %s1206_s11 }
  0x58   : > { %p1215_p1 = scmp.lt.u32.totalorder %s1206_s11, %s1550_s23 }
  0x59   : > { %p1209_p5 = pnand %p1208_p4, %p1207_p2  ;;  %p1214_p13 = por %p1213_p10, %p1212_p9 }
  0x5b   : > { %p1210_p7 = pneg %p1209_p5  ;;  %p1216_p3 = por %p1215_p1, %p1214_p13 }
  0x5d   : > { %p1217_p6 = pnand %p1216_p3, %p1210_p7 }
  0x5f   : > { %1220 = shalt.err (!%p1217_p6)
}
  0x60   : > { %s1221_s12 = scalar_lea.vmem %s1554_s24, 128  ;;  %s1364_s20 = smov [#allocation3]  }
  0x61   : > { %p1222_p0 = scmp.ne.s32.totalorder %s1554_s24, %s1221_s12  ;;  %s1226_s21 = sshll.u32 %s1364_s20, 4  ;;  %s1227_s21 = int_to_ptr.vmem [resolvable:$false] %s1226_s21 }
  0x62   : > { %s1228_s22 = scalar_lea.vmem %s1227_s21, 256  ;;  %p1229_p8 = scmp.lt.s32.totalorder %s1554_s24, %s1227_s21 }
  0x63   : > { %p1224_p2 = pnand %p1222_p0, %p1208_p4  ;;  %p1230_p9 = scmp.lt.s32.totalorder %s1228_s22, %s1221_s12 }
  0x65   : > { %p1225_p5 = pneg %p1224_p2  ;;  %p1231_p10 = por %p1230_p9, %p1229_p8 }
  0x67   : > { %p1232_p13 = pnand %p1231_p10, %p1225_p5 }
  0x69   : > { %1235 = shalt.err (!%p1232_p13)
}
  0x6a   : > { %s1365_s11 = smov 128   ;;  %s1767_s13 = smov 64  }
  0x6b   : > { %1045 = dma.hbm_to_vmem [thread:$0]  (!%p1475_p12), %s1550_s23, 128, %s1554_s24, %s276_s17, %s1365_s11, %s1767_s13, %s1363_s15  }
  0x6c   : > { %s1768_s16 = sadd.s32 1, %s1346_s26  ;;  %s298_s20 = sand.u32 1, %s1358_s29  }
  0x6d   : > { %s1595_s12 = scalar_select %p1556_p11, %s1346_s26, %s1768_s16  }
  0x6e   : > { %s889_s21 = sshll.u32 %s1540_s18, 6  ;;  %s931_s22 = sshll.u32 %s1354_s28, 10 }
  0x6f   : > { %s302_s0 = scalar_lea.vmem [#allocation6], %s889_s21  ;;  %s1603_s7 = scalar_lea.hbm %s1740_s1, %s931_s22 }
  0x70   : > { %s309_s3 = sshll.u32 %s302_s0, 4  ;;  %s1607_s23 = scalar_lea.sflag [#allocation7], %s298_s20  ;;  %s1605_s3 = int_to_ptr.vmem [resolvable:$true] %s309_s3 }
  0x71   : > { %s1236_s24 = scalar_lea.hbm %s1603_s7, 1024  ;;  %s1241_s5 = scalar_lea.hbm %s1740_s1, 2048 }
  0x72   : > { %p1237_p8 = scmp.ne.s32.totalorder %s1603_s7, %s1236_s24  ;;  %p1242_p1 = scmp.lt.u32.totalorder %s1603_s7, %s1740_s1 }
  0x73   : > { %p1243_p3 = scmp.lt.u32.totalorder %s1241_s5, %s1236_s24  ;;  %p1245_p0 = scmp.lt.u32.totalorder %s1236_s24, %s1603_s7 }
  0x74   : > { %p1239_p11 = pnand %p1237_p8, %p1208_p4 }
  0x75   : > { %p1244_p6 = por %p1243_p3, %p1242_p1 }
  0x76   : > { %p1240_p7 = pneg %p1239_p11 }
  0x77   : > { %p1246_p2 = por %p1245_p0, %p1244_p6 }
  0x79   : > { %p1247_p5 = pnand %p1246_p2, %p1240_p7 }
  0x7b   : > { %1250 = shalt.err (!%p1247_p5)
}
  0x7c   : > { %s1251_s17 = scalar_lea.vmem %s1605_s3, 1024  ;;  %s1366_s11 = smov [#allocation6]  }
  0x7d   : > { %p1252_p9 = scmp.ne.s32.totalorder %s1605_s3, %s1251_s17  ;;  %s1256_s16 = sshll.u32 %s1366_s11, 4  ;;  %s1257_s16 = int_to_ptr.vmem [resolvable:$false] %s1256_s16 }
  0x7e   : > { %s1258_s20 = scalar_lea.vmem %s1257_s16, 2048  ;;  %p1259_p8 = scmp.lt.s32.totalorder %s1605_s3, %s1257_s16 }
  0x7f   : > { %p1254_p10 = pnand %p1252_p9, %p1208_p4  ;;  %p1260_p11 = scmp.lt.s32.totalorder %s1258_s20, %s1251_s17 }
  0x81   : > { %p1255_p13 = pneg %p1254_p10  ;;  %p1261_p1 = por %p1260_p11, %p1259_p8 }
  0x83   : > { %p1262_p3 = pnand %p1261_p1, %p1255_p13 }
  0x85   : > { %1265 = shalt.err (!%p1262_p3)
}
  0x86   : > { %1048 = dma.hbm_to_vmem [thread:$0]  (!%p1475_p12), %s1603_s7, 1024, %s1605_s3, %s1607_s23, %s1767_s13, %s1767_s13, %s1363_s15  }
  0x87   : > { %p1769_p4 = scmp.ne.s32.totalorder %s1759_s10, 0 }
  0x88   : > { %s323_s21 = sand.u32 (!%p1769_p4), 1, %s1342_s25   ;;  %p1770_p7 = scmp.ne.s32.totalorder (!%p1769_p4), %s1758_s9, 0 }
  0x89   : > { %321 = sbr.rel (%p1769_p4) target bundleno = 1068 (0x42c), region = 48  ;;  %s893_s22 = sshll.u32 (!%p1769_p4), %s323_s21, 3 }
  0x8a   : > { %s324_s24 = scalar_lea.sflag (!%p1769_p4), [#allocation4], %s323_s21  ;;  %s1639_s0 = scalar_lea.vmem (!%p1769_p4), [#allocation3], %s893_s22 }
  0x90   : > { %1317 = dma.done.wait (%p1770_p7), %s324_s24, 128  }
  0x91   : > { %1319 = vsyncadd (%p1770_p7), %s324_s24, 4294967168  ;;  %s332_s14 = sand.u32 1, %s1444_s30   ;;  %s894_s18 = sshll.u32 %s323_s21, 6 }
  0x92   : > { %s333_s3 = scalar_lea.sflag [#allocation7], %s332_s14  ;;  %s1646_s7 = scalar_lea.vmem [#allocation6], %s894_s18 }
  0x93   : > { %1321 = dma.done.wait (%p1770_p7), %s333_s3, 1024  }
  0x94   : > { %1323 = vsyncadd (%p1770_p7), %s333_s3, 4294966272  ;;  %p1771_p12 = scmp.eq.s32.totalorder %s1444_s30, 0 }
  0x96   : > { %1325 = dma.done.wait (%p1771_p12), [#allocation7], 1024   ;;  %p1772_p6 = pmov %p1771_p12 }
  0x98   : > { %1327 = vsyncadd (%p1772_p6), [#allocation7], 4294966272  ;;  %p1773_p0 = pmov %p1772_p6 }
  0x9a   : > { %1329 = dma.done.wait (%p1773_p0), [#allocation10], 1024   ;;  %p1774_p2 = pmov %p1773_p0 }
  0x9b   : > { %p897_p5 = scmp.ne.s32.totalorder %s1350_s27, 0 }
  0x9c   : > { %1331 = vsyncadd (%p1774_p2), [#allocation10], 4294966272  ;;  %v1367_v0 = vmov (!%p897_p5), 0.0  }
  0x9d   : > { %382 = sbr.rel (%p897_p5) target bundleno = 164 (0xa4), region = 68  ;;  %383 = vst [vmem:[#allocation2] sm:$0xff] (!%p897_p5), %v1367_v0  ;;  %384 = vst [vmem:[#allocation2 + $0x8] sm:$0xff] (!%p897_p5), %v1367_v0 }
  0xa4 PF: > { %v1117_v1 = vld [vmem:[%s1646_s7] sm:$0xff]   ;;  %v1368_v2 = vmov 0.0   ;;  %v1118_v3 = vld [vmem:[%s1646_s7 + $0x8] sm:$0xff]   ;;  %vm1369_vm0 = vmmov 0   ;;  %v1119_v4 = vld [vmem:[%s1646_s7 + $0x10] sm:$0xff]   ;;  %p907_p9 = scmp.ne.s32.totalorder %s1350_s27, 1 }
  0xa5   : > { %959 = vmatprep.subr.bf16.mxu0 %v1368_v2  ;;  %975 = vmatprep.mubr.msk.bf16.mxu0 %vm1369_vm0, %v1368_v2  ;;  %v1120_v5 = vld [vmem:[%s1646_s7 + $0x18] sm:$0xff]   ;;  %v1121_v6 = vld [vmem:[%s1646_s7 + $0x20] sm:$0xff]   ;;  %v1122_v7 = vld [vmem:[%s1646_s7 + $0x28] sm:$0xff]   ;;  %v1370_v20 = vmov (!%p907_p9), 0.0   ;;  %vm1371_vm1 = vmmov (!%p907_p9), 0  }
  0xa6   : > { %960 = vmatpush3.bf16.msra.mxu0 %v1117_v1  ;;  %v1123_v8 = vld [vmem:[%s1646_s7 + $0x30] sm:$0xff]   ;;  %v1124_v9 = vld [vmem:[%s1646_s7 + $0x38] sm:$0xff]   ;;  %v385_v11 = vld [vmem:[#allocation2] sm:$0xff]  ;;  %999 = vmatprep.subr.bf16.mxu1 (!%p907_p9), %v1370_v20 }
  0xa7   : > { %961 = vmatprep.subr.bf16.mxu0 %v1368_v2  ;;  %v1125_v10 = vld [vmem:[%s1639_s0] sm:$0xff]   ;;  %v386_v13 = vld [vmem:[#allocation2 + $0x8] sm:$0xff]  ;;  %v1126_v19 = vld [vmem:[#allocation8] sm:$0xff] (!%p907_p9)   ;;  %1015 = vmatprep.mubr.msk.bf16.mxu1 (!%p907_p9), %vm1371_vm1, %v1370_v20 }
  0xa8   : > { %v1127_v21 = vld [vmem:[#allocation8 + $0x8] sm:$0xff] (!%p907_p9)   ;;  %v1128_v22 = vld [vmem:[#allocation8 + $0x10] sm:$0xff] (!%p907_p9)   ;;  %v1129_v23 = vld [vmem:[#allocation8 + $0x18] sm:$0xff] (!%p907_p9)  }
  0xa9   : > { %v1130_v24 = vld [vmem:[#allocation8 + $0x20] sm:$0xff] (!%p907_p9)   ;;  %v1131_v25 = vld [vmem:[#allocation8 + $0x28] sm:$0xff] (!%p907_p9)   ;;  %v1132_v31 = vld [vmem:[#allocation8 + $0x30] sm:$0xff] (!%p907_p9)  }
  0xaa   : > { %962 = vmatpush3.bf16.msra.mxu0 %v1118_v3  ;;  %v908_v28 = vld [vmem:[%s1741_s2] ss:$0 sm:$0xff] (!%p907_p9)  ;;  %v1133_v34 = vld [vmem:[#allocation8 + $0x38] sm:$0xff] (!%p907_p9)   ;;  %v1135_v37 = vld [vmem:[#allocation9 + $0x8] sm:$0xff] (!%p907_p9)  }
  0xab   : > { %963 = vmatprep.subr.bf16.mxu0 %v1368_v2  ;;  %v1134_v36 = vld [vmem:[#allocation9] sm:$0xff] (!%p907_p9)   ;;  %v1136_v38 = vld [vmem:[#allocation9 + $0x10] sm:$0xff] (!%p907_p9)   ;;  %v1137_v50 = vld [vmem:[#allocation9 + $0x18] sm:$0xff] (!%p907_p9)  }
  0xac   : > { %1000 = vmatpush3.bf16.msra.mxu1 (!%p907_p9), %v1134_v36  ;;  %v909_v39 = vld [vmem:[%s1743_s4] ss:$0 sm:$0xff] (!%p907_p9)  ;;  %v1139_v52 = vld [vmem:[#allocation9 + $0x28] sm:$0xff] (!%p907_p9)   ;;  %v1140_v53 = vld [vmem:[#allocation9 + $0x30] sm:$0xff] (!%p907_p9)  }
  0xad   : > { %1001 = vmatprep.subr.bf16.mxu1 (!%p907_p9), %v1370_v20  ;;  %v1138_v51 = vld [vmem:[#allocation9 + $0x20] sm:$0xff] (!%p907_p9)   ;;  %v1141_v54 = vld [vmem:[#allocation9 + $0x38] sm:$0xff] (!%p907_p9)  }
  0xae   : > { %964 = vmatpush3.bf16.msra.mxu0 %v1119_v4  ;;  %v918_v0 = vld [vmem:[%s1745_s6] ss:$0 sm:$0xff] (!%p907_p9) }
  0xaf   : > { %965 = vmatprep.subr.bf16.mxu0 %v1368_v2 }
  0xb0   : > { %1002 = vmatpush3.bf16.msra.mxu1 (!%p907_p9), %v1135_v37 }
  0xb1   : > { %1003 = vmatprep.subr.bf16.mxu1 (!%p907_p9), %v1370_v20 }
  0xb2   : > { %966 = vmatpush3.bf16.msra.mxu0 %v1120_v5 }
  0xb3   : > { %967 = vmatprep.subr.bf16.mxu0 %v1368_v2 }
  0xb4   : > { %1004 = vmatpush3.bf16.msra.mxu1 (!%p907_p9), %v1136_v38 }
  0xb5   : > { %1005 = vmatprep.subr.bf16.mxu1 (!%p907_p9), %v1370_v20 }
  0xb6   : > { %968 = vmatpush3.bf16.msra.mxu0 %v1121_v6 }
  0xb7   : > { %969 = vmatprep.subr.bf16.mxu0 %v1368_v2 }
  0xb8   : > { %1006 = vmatpush3.bf16.msra.mxu1 (!%p907_p9), %v1137_v50 }
  0xb9   : > { %1007 = vmatprep.subr.bf16.mxu1 (!%p907_p9), %v1370_v20 }
  0xba   : > { %970 = vmatpush3.bf16.msra.mxu0 %v1122_v7 }
  0xbb   : > { %971 = vmatprep.subr.bf16.mxu0 %v1368_v2 }
  0xbc   : > { %1008 = vmatpush3.bf16.msra.mxu1 (!%p907_p9), %v1138_v51 }
  0xbd   : > { %1009 = vmatprep.subr.bf16.mxu1 (!%p907_p9), %v1370_v20 }
  0xbe   : > { %972 = vmatpush3.bf16.msra.mxu0 %v1123_v8 }
  0xbf   : > { %973 = vmatprep.subr.bf16.mxu0 %v1368_v2 }
  0xc0   : > { %1010 = vmatpush3.bf16.msra.mxu1 (!%p907_p9), %v1139_v52 }
  0xc1   : > { %1011 = vmatprep.subr.bf16.mxu1 (!%p907_p9), %v1370_v20 }
  0xc2   : > { %974 = vmatpush3.bf16.msra.mxu0 %v1124_v9 }
  0xc3   : > { %979 = vmatprep.subr.bf16.mxu0 (!%p907_p9), %v1370_v20 }
  0xc4   : > { %1012 = vmatpush3.bf16.msra.mxu1 (!%p907_p9), %v1140_v53 }
  0xc5   : > { %976 = vmatmul.mubr.bf16.vlgmr.msra.gmra.mrb[0].mxu0 %v1125_v10  ;;  %1013 = vmatprep.subr.bf16.mxu1 (!%p907_p9), %v1370_v20 }
  0xc6   : > { %980 = vmatpush3.bf16.msra.mxu0 (!%p907_p9), %v1126_v19  ;;  %995 = vmatprep.mubr.msk.bf16.mxu0 (!%p907_p9), %vm1371_vm1, %v1370_v20 }
  0xc7   : > { %981 = vmatprep.subr.bf16.mxu0 (!%p907_p9), %v1370_v20 }
  0xc8   : > { %1014 = vmatpush3.bf16.msra.mxu1 (!%p907_p9), %v1141_v54 }
  0xca   : > { %982 = vmatpush3.bf16.msra.mxu0 (!%p907_p9), %v1127_v21 }
  0xcb   : > { %983 = vmatprep.subr.bf16.mxu0 (!%p907_p9), %v1370_v20 }
  0xce   : > { %984 = vmatpush3.bf16.msra.mxu0 (!%p907_p9), %v1128_v22 }
  0xcf   : > { %985 = vmatprep.subr.bf16.mxu0 (!%p907_p9), %v1370_v20 }
  0xd2   : > { %986 = vmatpush3.bf16.msra.mxu0 (!%p907_p9), %v1129_v23 }
  0xd3   : > { %987 = vmatprep.subr.bf16.mxu0 (!%p907_p9), %v1370_v20 }
  0xd6   : > { %988 = vmatpush3.bf16.msra.mxu0 (!%p907_p9), %v1130_v24 }
  0xd7   : > { %989 = vmatprep.subr.bf16.mxu0 (!%p907_p9), %v1370_v20 }
  0xda   : > { %990 = vmatpush3.bf16.msra.mxu0 (!%p907_p9), %v1131_v25 }
  0xdb   : > { %991 = vmatprep.subr.bf16.mxu0 (!%p907_p9), %v1370_v20 }
  0xde   : > { %992 = vmatpush3.bf16.msra.mxu0 (!%p907_p9), %v1132_v31 }
  0xdf   : > { %993 = vmatprep.subr.bf16.mxu0 (!%p907_p9), %v1370_v20 }
  0xe2   : > { %994 = vmatpush3.bf16.msra.mxu0 (!%p907_p9), %v1133_v34 }
 0x197   : > { %507 = sbr.rel (%p907_p9) target bundleno = 1036 (0x40c), region = 72 }
 0x198   : > { %v493_v12 = vpop.f32.mrb[0].mxu0 }
 0x199   : > { %v500_v14 = vadd.f32 %v493_v12, %v385_v11  ;;  %v977_v15 = vpop.f32.mrb[1].mxu0 }
 0x19a   : > { %v496_v16 = vpop.f32.mrb[2].mxu0 }
 0x19b   : > { %502 = vst [vmem:[#allocation2] sm:$0xff] %v500_v14  ;;  %v501_v17 = vadd.f32 %v496_v16, %v386_v13  ;;  %v978_v18 = vpop.f32.mrb[3].mxu0 }
 0x19d   : > { %503 = vst [vmem:[#allocation2 + $0x8] sm:$0xff] %v501_v17 }
 0x1a2   : > { %v508_v26 = vld [vmem:[#allocation2] sm:$0xff] }
 0x1a3   : > { %v517_v29 = vadd.f32 %v908_v28, %v508_v26 }
 0x1a4   : > { %v509_v27 = vld [vmem:[#allocation2 + $0x8] sm:$0xff] }
 0x1a5   : > { %v518_v30 = vadd.f32 %v908_v28, %v509_v27  ;;  %v519_v32 = vmax.f32 %v517_v29, 0.0 }
 0x1a7   : > { %v520_v33 = vmax.f32 %v518_v30, 0.0 }
 0x1a9   : > { %v521_v35 = vpack.c.bf16 %v520_v33, %v519_v32 }
 0x1ab   : > { %996 = vmatmul.mubr.bf16.vlgmr.msra.gmra.mrb[0].mxu0 %v521_v35 }
 0x27e   : > { %v627_v40 = vpop.f32.mrb[0].mxu0 }
 0x27f   : > { %v628_v41 = vadd.f32 %v909_v39, %v627_v40  ;;  %v997_v42 = vpop.f32.mrb[1].mxu0 }
 0x280   : > { %v630_v43 = vpop.f32.mrb[2].mxu0 }
 0x281   : > { %v634_v44 = vmax.f32 %v628_v41, 0.0  ;;  %v631_v45 = vadd.f32 %v909_v39, %v630_v43  ;;  %v998_v46 = vpop.f32.mrb[3].mxu0 }
 0x283   : > { %v635_v47 = vmax.f32 %v631_v45, 0.0  ;;  %v636_v48 = vmul.f32 %v634_v44, %v634_v44 }
 0x285   : > { %638 = vadd.xlane.f32.xlu0 %v636_v48  ;;  %v637_v49 = vmul.f32 %v635_v47, %v635_v47 }
 0x289   : > { %640 = vadd.xlane.f32.xlu0 %v637_v49 }
 0x312   : > { %v639_v55 = vpop.xlane.xlu0 %638 }
 0x313   : > { %v642_v56 = vadd.f32 1e-12, %v639_v55 }
 0x315   : > { %1142 = vrsqrt.f32 %v642_v56 }
 0x316   : > { %v641_v57 = vpop.xlane.xlu0 %640 }
 0x317   : > { %v643_v58 = vadd.f32 1e-12, %v641_v57 }
 0x319   : > { %1144 = vrsqrt.f32 %v643_v58 }
 0x31f   : > { %v1143_v59 = vpop.eup %1142 }
 0x320   : > { %v646_v61 = vmul.f32 %v1143_v59, %v634_v44 }
 0x323   : > { %v1145_v60 = vpop.eup %1144 }
 0x324   : > { %v647_v62 = vmul.f32 %v1145_v60, %v635_v47 }
 0x326   : > { %v648_v63 = vpack.c.bf16 %v647_v62, %v646_v61 }
 0x328   : > { %1016 = vmatmul.mubr.bf16.vlgmr.msra.gmra.mrb[0].mxu1 %v648_v63 }
 0x3fb   : > { %v754_v1 = vpop.f32.mrb[0].mxu1 }
 0x3fc   : > { %v755_v2 = vadd.f32 %v918_v0, %v754_v1  ;;  %v1017_v3 = vpop.f32.mrb[1].mxu1 }
 0x3fd   : > { %v757_v4 = vpop.f32.mrb[2].mxu1 }
 0x3fe   : > { %1146 = vtanh.f32 %v755_v2  ;;  %v758_v5 = vadd.f32 %v918_v0, %v757_v4  ;;  %v1018_v6 = vpop.f32.mrb[3].mxu1 }
 0x400   : > { %1148 = vtanh.f32 %v758_v5 }
 0x408   : > { %v1147_v7 = vpop.eup %1146 }
 0x409   : > { %763 = vst [vmem:[#allocation11] sm:$0xff] %v1147_v7 }
 0x40a   : > { %v1149_v8 = vpop.eup %1148 }
 0x40b   : > { %764 = vst [vmem:[#allocation11 + $0x8] sm:$0xff] %v1149_v8 }
 0x40c PF: > { %p1054_p10 = scmp.eq.s32.totalorder %s1444_s30, 1  ;;  %s1372_s5 = smov [#allocation11]  }
 0x40d   : > { %s774_s19 = sshll.u32 %s1372_s5, 4  ;;  %s775_s19 = int_to_ptr.vmem [resolvable:$true] %s774_s19 }
 0x40e   : > { %s1266_s8 = scalar_lea.vmem %s775_s19, 256  ;;  %p1273_p1 = scmp.lt.s32.totalorder %s775_s19, %s775_s19 }
 0x40f   : > { %p1267_p13 = scmp.ne.s32.totalorder %s775_s19, %s1266_s8  ;;  %p1274_p3 = scmp.lt.s32.totalorder %s1266_s8, %s1266_s8 }
 0x411   : > { %p1268_p8 = pnand %p1267_p13, %p1054_p10  ;;  %p1275_p4 = por %p1274_p3, %p1273_p1 }
 0x413   : > { %p1269_p11 = pneg %p1268_p8 }
 0x415   : > { %p1276_p7 = pnand %p1275_p4, %p1269_p11 }
 0x417   : > { %1279 = shalt.err (!%p1276_p7)
}
 0x418   : > { %s1775_s16 = sld [smem:[#allocation21_spill]] }
 0x41e   : > { %s1280_s20 = scalar_lea.hbm %s1775_s16, 256 }
 0x41f   : > { %p1281_p12 = scmp.ne.s32.totalorder %s1775_s16, %s1280_s20  ;;  %p1286_p2 = scmp.lt.u32.totalorder %s1280_s20, %s1775_s16 }
 0x421   : > { %p1282_p6 = pnand %p1281_p12, %p1054_p10 }
 0x423   : > { %p1283_p0 = pneg %p1282_p6 }
 0x425   : > { %p1288_p5 = pnand %p1286_p2, %p1283_p0 }
 0x427   : > { %1291 = shalt.err (!%p1288_p5)
}
 0x428   : > { %s1373_s14 = smov 128   ;;  %s1374_s18 = smov 8  }
 0x429   : > { %1032 = dma.vmem_to_hbm [thread:$0]  (%p1054_p10), %s775_s19, 256, %s1775_s16, [#allocation5], %s1373_s14, %s1373_s14, %s1374_s18  }
 0x42a   : > { %1333 = dma.done.wait (%p1054_p10), [#allocation5], 256  }
 0x42b   : > { %1335 = vsyncadd (%p1054_p10), [#allocation5], 4294967040 }
 0x42c PF: > { %s25_s29 = sadd.s32 1, %s1358_s29   ;;  %s1776_s9 = sld [smem:[#allocation17_spill]] }
 0x42d   : > { %p22_p9 = scmp.ge.s32.totalorder %s25_s29, 4   ;;  %s1777_s24 = smov %s1342_s25 }
 0x42e   : > { %s1778_s25 = smov %s1346_s26  ;;  %s1779_s26 = smov %s1595_s12 }
 0x42f   : > { %s1780_s27 = smov %s1354_s28  ;;  %24 = sbr.rel (!%p22_p9) target bundleno = 13 (0xd), region = 115 }
 0x432   : > { %s1781_s28 = smov %s1776_s9 }
 0x436   :  { %790 = vsyncpa [#allocation4], 1 }
 0x437   :  { %792 = vsyncpa [#allocation4 + $0x1], 1 }
 0x438   :  { %793 = vsyncpa [#allocation7], 1 }
 0x439   :  { %795 = vsyncpa [#allocation7 + $0x1], 1 }
 0x43a   :  { %796 = vsyncpa [#allocation10], 1 }
 0x43b   :  { %797 = vsyncpa [#allocation5], 1 }
 0x43c   :  { %799 = vsyncpa [#allocation5 + $0x1], 1 }

</bundles_post_ra>
